<compile_context>
chip_gen: v7x
topology: tpu7x:2x2x1
jax: 0.10.0
libtpu: 0.0.40
codegen_flags: <defaults>
</compile_context>

<pallas_src>
import jax
import jax.numpy as jnp
from jax.experimental import pallas as pl
from jax.experimental.pallas import tpu as pltpu


def encoder_kernel(x_ref, w1t_ref, b1_ref, w2t_ref, b2_ref, out_ref):
    # x_ref:   (tb, Din)   batch tile of flattened input (matmul dtype)
    # w1t_ref: (Din, Hd)   W1^T, resident across batch tiles (matmul dtype)
    # b1_ref:  (1, Hd)     f32
    # w2t_ref: (Hd, Z)     W2^T, resident (matmul dtype)
    # b2_ref:  (1, Z)      f32
    # out_ref: (tb, Z)     f32 output tile
    h = jnp.dot(x_ref[...], w1t_ref[...], preferred_element_type=jnp.float32)
    h = jax.nn.sigmoid(h + b1_ref[...])          # bias + sigmoid in f32 (EUP)
    h = h.astype(w2t_ref.dtype)                  # back to bf16 for 2nd MXU pass
    o = jnp.dot(h, w2t_ref[...], preferred_element_type=jnp.float32)
    out_ref[...] = (o + b2_ref[...]).astype(out_ref.dtype)


def encoder_forward(x_nchw, w1, b1, w2, b2, *, tb=None, matmul_dtype=jnp.bfloat16):
    """x_nchw: (B, C, H, W).  w1: (Hd, Din), b1: (Hd,), w2: (Z, Hd), b2: (Z,).

    Returns (out, j_e) matching the PyTorch module.
    """
    B = x_nchw.shape[0]
    x = x_nchw.reshape(B, -1)                    # == torch x.view(B, -1)
    Din = x.shape[1]
    Hd = w1.shape[0]
    Z = w2.shape[0]

    # j_e hoisted out of the per-tile kernel: constant of the weights, a
    # trivial reduction XLA handles well.
    j_e = jnp.sum(jnp.square(w1)) + jnp.sum(jnp.square(w2))

    # Batch tiling: sublane-align (multiple of 8); single grid step when the
    # padded batch fits in 256 rows, MXU-shaped 256-row tiles otherwise.
    b_aligned = -(-B // 8) * 8
    if tb is None:
        tb = b_aligned if b_aligned <= 256 else 256
    n_tiles = -(-B // tb)
    Bp = n_tiles * tb
    if Bp != B:
        x = jnp.pad(x, ((0, Bp - B), (0, 0)))

    # Cast MXU operands to bf16 (native MXU rate, halves x/weight DMA); biases
    # and all post-matmul math stay f32.
    xm = x.astype(matmul_dtype)
    w1t = w1.T.astype(matmul_dtype)              # (Din, Hd)
    w2t = w2.T.astype(matmul_dtype)              # (Hd, Z)
    b1r = b1.reshape(1, Hd).astype(jnp.float32)
    b2r = b2.reshape(1, Z).astype(jnp.float32)

    op_bytes = jnp.dtype(matmul_dtype).itemsize
    cost = pl.CostEstimate(
        flops=2 * Bp * (Din * Hd + Hd * Z),
        transcendentals=Bp * Hd,                 # sigmoid exp per hidden act
        bytes_accessed=(Bp * Din + Din * Hd + Hd * Z) * op_bytes
                       + (Hd + Z) * 4 + Bp * Z * 4,
    )

    # Size the VMEM limit from the actual tiles (double-buffered x/out tiles,
    # possibly double-buffered resident weights), with a 32 MiB floor.
    weight_bytes = (Din * Hd + Hd * Z) * op_bytes
    io_bytes = 2 * (tb * Din * op_bytes + tb * Z * 4)
    bias_bytes = 2 * (Hd + Z) * 4
    vmem_need = 2 * weight_bytes + io_bytes + bias_bytes + (4 << 20)
    vmem_limit = int(min(max(32 << 20, vmem_need), 120 << 20))

    out = pl.pallas_call(
        encoder_kernel,
        out_shape=jax.ShapeDtypeStruct((Bp, Z), jnp.float32),
        grid_spec=pltpu.PrefetchScalarGridSpec(
            num_scalar_prefetch=0,
            grid=(n_tiles,),
            in_specs=[
                pl.BlockSpec((tb, Din), lambda i: (i, 0)),   # x tile over batch
                pl.BlockSpec((Din, Hd), lambda i: (0, 0)),   # W1^T (resident)
                pl.BlockSpec((1, Hd), lambda i: (0, 0)),     # b1
                pl.BlockSpec((Hd, Z), lambda i: (0, 0)),     # W2^T (resident)
                pl.BlockSpec((1, Z), lambda i: (0, 0)),      # b2
            ],
            out_specs=pl.BlockSpec((tb, Z), lambda i: (i, 0)),  # lane-dense
        ),
        compiler_params=pltpu.CompilerParams(
            dimension_semantics=("parallel",),   # batch axis fully parallel
            vmem_limit_bytes=vmem_limit,
        ),
        cost_estimate=cost,
    )(xm, w1t, b1r, w2t, b2r)

    if Bp != B:
        out = out[:B]
    return out, j_e


def init_linear_params(key, out_features, in_features):
    """Deterministic init mimicking torch.nn.Linear defaults (uniform +/-1/sqrt(fan_in))."""
    kw, kb = jax.random.split(key)
    bound = 1.0 / (in_features ** 0.5)
    w = jax.random.uniform(kw, (out_features, in_features), jnp.float32,
                           minval=-bound, maxval=bound)
    b = jax.random.uniform(kb, (out_features,), jnp.float32,
                           minval=-bound, maxval=bound)
    return w, b


def encoder_reference(x_nchw, w1, b1, w2, b2, matmul_dtype=jnp.float32):
    """Pure-JAX reference; optionally mirrors the kernel's bf16 operand cast."""
    x = x_nchw.reshape(x_nchw.shape[0], -1).astype(matmul_dtype)
    w1t = w1.T.astype(matmul_dtype)
    w2t = w2.T.astype(matmul_dtype)
    h = jax.nn.sigmoid(
        jnp.dot(x, w1t, preferred_element_type=jnp.float32) + b1)
    out = jnp.dot(h.astype(matmul_dtype), w2t,
                  preferred_element_type=jnp.float32) + b2
    je = jnp.sum(jnp.square(w1)) + jnp.sum(jnp.square(w2))
    return out, je


if __name__ == "__main__":
    # Small, module-consistent shapes:
    #   batch=2, channels=4, spatial=16x16  ->  in_channel = 1024
    #   hidden_dim = 256, z_dim = 128
    B, C, Hh, Ww = 2, 4, 16, 16
    in_channel = C * Hh * Ww          # 1024
    hidden_dim = 256
    z_dim = 128

    key = jax.random.PRNGKey(0)
    kx, k1, k2 = jax.random.split(key, 3)

    x = jax.random.normal(kx, (B, C, Hh, Ww), jnp.float32)
    w1, b1 = init_linear_params(k1, hidden_dim, in_channel)
    w2, b2 = init_linear_params(k2, z_dim, hidden_dim)

    out, j_e = encoder_forward(x, w1, b1, w2, b2)
    out = jax.block_until_ready(out)
    j_e = jax.block_until_ready(j_e)
    assert out.shape == (B, z_dim)

    # Tight check against a reference using the same bf16 operand cast.
    ref_out_bf16, ref_je = encoder_reference(x, w1, b1, w2, b2,
                                             matmul_dtype=jnp.bfloat16)
    assert jnp.allclose(out, ref_out_bf16, atol=1e-3, rtol=1e-3), \
        "output mismatch vs bf16-operand reference"

    # Loose check against the full-f32 reference (bf16 operand rounding only).
    ref_out_f32, _ = encoder_reference(x, w1, b1, w2, b2,
                                       matmul_dtype=jnp.float32)
    assert jnp.allclose(out, ref_out_f32, atol=5e-2, rtol=5e-2), \
        "output mismatch vs f32 reference"

    assert jnp.allclose(j_e, ref_je, atol=1e-4, rtol=1e-5), "j_e mismatch"

    print("KERNEL_OK")
</pallas_src>

<mosaic_0001>
module attributes {stable_mosaic.version = 11 : i64} {
  func.func @encoder_kernel(%arg0: i32, %arg1: memref<8x1024xbf16, #tpu.memory_space<vmem>>, %arg2: memref<1024x256xbf16, #tpu.memory_space<vmem>>, %arg3: memref<1x256xf32, #tpu.memory_space<vmem>>, %arg4: memref<256x128xbf16, #tpu.memory_space<vmem>>, %arg5: memref<1x128xf32, #tpu.memory_space<vmem>>, %arg6: memref<8x128xf32, #tpu.memory_space<vmem>>) attributes {dimension_semantics = [#tpu.dimension_semantics<parallel>], iteration_bounds = array<i64: 1>, scalar_prefetch = 0 : i64, scratch_operands = 0 : i64, tpu.core_type = #tpu.core_type<tc>, window_params = [{transform_indices = @transform_0, window_bounds = array<i64: 8, 1024>}, {pipeline_mode = #tpu.pipeline_mode<synchronous>, transform_indices = @transform_1, window_bounds = array<i64: 1024, 256>}, {pipeline_mode = #tpu.pipeline_mode<synchronous>, transform_indices = @transform_2, window_bounds = array<i64: 1, 256>}, {pipeline_mode = #tpu.pipeline_mode<synchronous>, transform_indices = @transform_3, window_bounds = array<i64: 256, 128>}, {pipeline_mode = #tpu.pipeline_mode<synchronous>, transform_indices = @transform_4, window_bounds = array<i64: 1, 128>}, {transform_indices = @transform_5, window_bounds = array<i64: 8, 128>}]} {
    %c0 = arith.constant 0 : index
    %c0_0 = arith.constant 0 : index
    %0 = vector.load %arg1[%c0, %c0_0] : memref<8x1024xbf16, #tpu.memory_space<vmem>>, vector<8x1024xbf16>
    %c0_1 = arith.constant 0 : index
    %c0_2 = arith.constant 0 : index
    %1 = vector.load %arg2[%c0_1, %c0_2] : memref<1024x256xbf16, #tpu.memory_space<vmem>>, vector<1024x256xbf16>
    %cst = arith.constant dense<0.000000e+00> : vector<8x256xf32>
    %2 = tpu.matmul %0, %1, %cst {dimension_numbers = #tpu.dot_dimension_numbers<[1], [0], [0], [1], [0, 0, 1, 1], [], []>} : vector<8x1024xbf16>, vector<1024x256xbf16>, vector<8x256xf32> -> vector<8x256xf32>
    %c0_3 = arith.constant 0 : index
    %c0_4 = arith.constant 0 : index
    %3 = vector.load %arg3[%c0_3, %c0_4] : memref<1x256xf32, #tpu.memory_space<vmem>>, vector<1x256xf32>
    %4 = vector.broadcast %3 : vector<1x256xf32> to vector<8x256xf32>
    %5 = arith.addf %2, %4 : vector<8x256xf32>
    %6 = arith.negf %5 : vector<8x256xf32>
    %7 = math.exp %6 : vector<8x256xf32>
    %cst_5 = arith.constant 1.000000e+00 : f32
    %8 = vector.broadcast %cst_5 : f32 to vector<8x256xf32>
    %9 = arith.addf %8, %7 : vector<8x256xf32>
    %10 = arith.divf %8, %9 : vector<8x256xf32>
    %11 = arith.truncf %10 : vector<8x256xf32> to vector<8x256xbf16>
    %c0_6 = arith.constant 0 : index
    %c0_7 = arith.constant 0 : index
    %12 = vector.load %arg4[%c0_6, %c0_7] : memref<256x128xbf16, #tpu.memory_space<vmem>>, vector<256x128xbf16>
    %cst_8 = arith.constant dense<0.000000e+00> : vector<8x128xf32>
    %13 = tpu.matmul %11, %12, %cst_8 {dimension_numbers = #tpu.dot_dimension_numbers<[1], [0], [0], [1], [0, 0, 1, 1], [], []>} : vector<8x256xbf16>, vector<256x128xbf16>, vector<8x128xf32> -> vector<8x128xf32>
    %c0_9 = arith.constant 0 : index
    %c0_10 = arith.constant 0 : index
    %14 = vector.load %arg5[%c0_9, %c0_10] : memref<1x128xf32, #tpu.memory_space<vmem>>, vector<1x128xf32>
    %15 = vector.broadcast %14 : vector<1x128xf32> to vector<8x128xf32>
    %16 = arith.addf %13, %15 : vector<8x128xf32>
    %c0_11 = arith.constant 0 : index
    %c0_12 = arith.constant 0 : index
    %17 = vector.load %arg6[%c0_11, %c0_12] : memref<8x128xf32, #tpu.memory_space<vmem>>, vector<8x128xf32>
    tpu.vector_store %arg6[%c0_11, %c0_12], %16 {strides = array<i32>} : memref<8x128xf32, #tpu.memory_space<vmem>>, vector<8x128xf32>,
    return
  }
  func.func @transform_0(%arg0: i32) -> (i32, i32) {
    %c0_i32 = arith.constant 0 : i32
    %c0_i32_0 = arith.constant 0 : i32
    return %arg0, %c0_i32 : i32, i32
  }
  func.func @transform_1(%arg0: i32) -> (i32, i32) {
    %c0_i32 = arith.constant 0 : i32
    %c0_i32_0 = arith.constant 0 : i32
    %c0_i32_1 = arith.constant 0 : i32
    return %c0_i32, %c0_i32_0 : i32, i32
  }
  func.func @transform_2(%arg0: i32) -> (i32, i32) {
    %c0_i32 = arith.constant 0 : i32
    %c0_i32_0 = arith.constant 0 : i32
    %c0_i32_1 = arith.constant 0 : i32
    return %c0_i32, %c0_i32_0 : i32, i32
  }
  func.func @transform_3(%arg0: i32) -> (i32, i32) {
    %c0_i32 = arith.constant 0 : i32
    %c0_i32_0 = arith.constant 0 : i32
    %c0_i32_1 = arith.constant 0 : i32
    return %c0_i32, %c0_i32_0 : i32, i32
  }
  func.func @transform_4(%arg0: i32) -> (i32, i32) {
    %c0_i32 = arith.constant 0 : i32
    %c0_i32_0 = arith.constant 0 : i32
    %c0_i32_1 = arith.constant 0 : i32
    return %c0_i32, %c0_i32_0 : i32, i32
  }
  func.func @transform_5(%arg0: i32) -> (i32, i32) {
    %c0_i32 = arith.constant 0 : i32
    %c0_i32_0 = arith.constant 0 : i32
    return %arg0, %c0_i32 : i32, i32
  }
}

</mosaic_0001>

<bundles_post_ra>
// kernel: tpu_custom_call.1
= control target key start
LH: loop header
LB: loop body
LE: loop exit
PB: predicated region body
PF: predicated region fallthrough
CT: control target
= control target key end

     0   :  { %10 = vsyncpa [#allocation3], 0  ;;  %s1862_s0 = inlined_call_operand.hbm [shape: bf16[8,1024], index: 0, kind: input, shape index: {}]   ;;  %s1863_s1 = inlined_call_operand.hbm [shape: bf16[1024,256], index: 1, kind: input, shape index: {}]   ;;  %s1864_s2 = inlined_call_operand.vmem [shape: f32[1,256], index: 2, kind: input, shape index: {}]   ;;  %s1865_s3 = inlined_call_operand.hbm [shape: bf16[256,128], index: 3, kind: input, shape index: {}]   ;;  %s1866_s4 = inlined_call_operand.vmem [shape: f32[1,128], index: 4, kind: input, shape index: {}]   ;;  %s1867_s5 = inlined_call_operand.hbm [shape: f32[8,128], index: 5, kind: output, shape index: {}]  }
   0x1   :  { %11 = vsyncpa [#allocation6], 0 }
   0x2   :  { %12 = vsyncpa [#allocation4], 0  ;;  %s1758_s18 = smov [#allocation5]   ;;  %s1664_s22 = scalar_lea.hbm %s1863_s1, 16384 }
   0x3   :  { %s28_s19 = sshll.u32 %s1758_s18, 4  ;;  %p1665_p0 = scmp.ne.s32.totalorder %s1863_s1, %s1664_s22  ;;  %s29_s19 = int_to_ptr.vmem [resolvable:$true] %s28_s19 }
   0x4   :  { %p1668_p1 = scmp.lt.u32.totalorder %s1664_s22, %s1863_s1 }
   0x6   :  { %p1670_p2 = pnand %p1668_p1, %p1665_p0 }
   0x8   :  { %1673 = shalt.err (!%p1670_p2)
}
   0x9   :  { %s1674_s27 = scalar_lea.vmem %s29_s19, 16384  ;;  %p1679_p4 = scmp.lt.s32.totalorder %s29_s19, %s29_s19 }
   0xa   :  { %p1675_p3 = scmp.ne.s32.totalorder %s29_s19, %s1674_s27  ;;  %p1680_p5 = scmp.lt.s32.totalorder %s1674_s27, %s1674_s27 }
   0xc   :  { %p1681_p6 = por %p1680_p5, %p1679_p4 }
   0xe   :  { %p1682_p7 = pnand %p1681_p6, %p1675_p3 }
  0x10   :  { %1685 = shalt.err (!%p1682_p7)
}
  0x11   :  { %s1759_s28 = smov 128   ;;  %s1760_s29 = smov 8  }
  0x12   :  { %34 = dma.hbm_to_vmem [thread:$0]  %s1863_s1, 16384, %s29_s19, [#allocation6], %s1759_s28, %s1759_s28, %s1760_s29  }
  0x13   :  { %s1761_s7 = smov [#allocation2]   ;;  %s1762_s9 = smov [#allocation7]  }
  0x14   :  { %s19_s8 = sshll.u32 %s1761_s7, 4  ;;  %s42_s10 = sshll.u32 %s1762_s9, 4  ;;  %s20_s8 = int_to_ptr.vmem [resolvable:$true] %s19_s8  ;;  %s43_s10 = int_to_ptr.vmem [resolvable:$true] %s42_s10 }
  0x15   :  { %s1686_s13 = scalar_lea.hbm %s1862_s0, 512 }
  0x16   :  { %p1687_p8 = scmp.ne.s32.totalorder %s1862_s0, %s1686_s13  ;;  %p1690_p9 = scmp.lt.u32.totalorder %s1686_s13, %s1862_s0 }
  0x18   :  { %p1692_p10 = pnand %p1690_p9, %p1687_p8 }
  0x1a   :  { %1695 = shalt.err (!%p1692_p10)
}
  0x1b   :  { %s1696_s1 = scalar_lea.vmem %s20_s8, 512  ;;  %p1701_p12 = scmp.lt.s32.totalorder %s20_s8, %s20_s8 }
  0x1c   :  { %p1697_p11 = scmp.ne.s32.totalorder %s20_s8, %s1696_s1  ;;  %p1702_p13 = scmp.lt.s32.totalorder %s1696_s1, %s1696_s1 }
  0x1e   :  { %p1703_p0 = por %p1702_p13, %p1701_p12 }
  0x20   :  { %p1704_p1 = pnand %p1703_p0, %p1697_p11 }
  0x22   :  { %1707 = shalt.err (!%p1704_p1)
}
  0x23   :  { %22 = dma.hbm_to_vmem [thread:$0]  %s1862_s0, 512, %s20_s8, [#allocation3]  }
  0x24   :  { %s1708_s22 = scalar_lea.hbm %s1865_s3, 2048 }
  0x25   :  { %p1709_p2 = scmp.ne.s32.totalorder %s1865_s3, %s1708_s22  ;;  %p1712_p3 = scmp.lt.u32.totalorder %s1708_s22, %s1865_s3 }
  0x27   :  { %p1714_p4 = pnand %p1712_p3, %p1709_p2 }
  0x29   :  { %1717 = shalt.err (!%p1714_p4)
}
  0x2a   :  { %s1718_s27 = scalar_lea.vmem %s43_s10, 2048  ;;  %p1723_p6 = scmp.lt.s32.totalorder %s43_s10, %s43_s10 }
  0x2b   :  { %p1719_p5 = scmp.ne.s32.totalorder %s43_s10, %s1718_s27  ;;  %p1724_p7 = scmp.lt.s32.totalorder %s1718_s27, %s1718_s27 }
  0x2d   :  { %p1725_p8 = por %p1724_p7, %p1723_p6 }
  0x2f   :  { %p1726_p9 = pnand %p1725_p8, %p1719_p5 }
  0x31   :  { %1729 = shalt.err (!%p1726_p9)
}
  0x32   :  { %s1763_s0 = smov 64   ;;  %s1764_s28 = smov 4  }
  0x33   :  { %48 = dma.hbm_to_vmem [thread:$0]  %s1865_s3, 2048, %s43_s10, [#allocation6], %s1763_s0, %s1763_s0, %s1764_s28  }
  0x34   :  { %1752 = dma.done.wait [#allocation3], 512  }
  0x35   :  { %1753 = vsyncadd [#allocation3], 4294966784 }
  0x36   :  { %1754 = dma.done.wait [#allocation6], 18432  }
  0x37   :  { %1755 = vsyncadd [#allocation6], 4294948864  ;;  %v1440_v0 = vld [vmem:[#allocation5 + $0x4] ss:$8 sps:$4 sm:$0xff]   ;;  %v1444_v2 = vld [vmem:[#allocation5] ss:$8 sps:$4 sm:$0xff]  }
  0x38   :  { %v1442_v1 = vld [vmem:[#allocation5 + $0x204] ss:$8 sps:$4 sm:$0xff]   ;;  %873 = vmatprep.subr.bf16.mxu1 %v1440_v0  ;;  %v1445_v3 = vld [vmem:[#allocation5 + $0x200] ss:$8 sps:$4 sm:$0xff]   ;;  %v1446_v4 = vld [vmem:[#allocation5 + $0x14] ss:$8 sps:$4 sm:$0xff]  }
  0x39   :  { %955 = vmatprep.subr.bf16.mxu0 %v1442_v1  ;;  %874 = vmatpush1.bf16.msra.mxu1 %v1444_v2  ;;  %v1448_v5 = vld [vmem:[#allocation5 + $0x214] ss:$8 sps:$4 sm:$0xff]   ;;  %v1450_v6 = vld [vmem:[#allocation5 + $0x10] ss:$8 sps:$4 sm:$0xff]   ;;  %v1452_v8 = vld [vmem:[#allocation5 + $0x24] ss:$8 sps:$4 sm:$0xff]  }
  0x3a   :  { %956 = vmatpush1.bf16.msra.mxu0 %v1445_v3  ;;  %875 = vmatprep.subr.bf16.mxu1 %v1446_v4  ;;  %v1451_v7 = vld [vmem:[#allocation5 + $0x210] ss:$8 sps:$4 sm:$0xff]   ;;  %v1454_v9 = vld [vmem:[#allocation5 + $0x224] ss:$8 sps:$4 sm:$0xff]   ;;  %v1456_v10 = vld [vmem:[#allocation5 + $0x20] ss:$8 sps:$4 sm:$0xff]  }
  0x3b   :  { %957 = vmatprep.subr.bf16.mxu0 %v1448_v5  ;;  %v1457_v11 = vld [vmem:[#allocation5 + $0x220] ss:$8 sps:$4 sm:$0xff]   ;;  %v1458_v12 = vld [vmem:[#allocation5 + $0x34] ss:$8 sps:$4 sm:$0xff]   ;;  %v1462_v14 = vld [vmem:[#allocation5 + $0x30] ss:$8 sps:$4 sm:$0xff]  }
  0x3c   :  { %v1460_v13 = vld [vmem:[#allocation5 + $0x234] ss:$8 sps:$4 sm:$0xff]   ;;  %v1463_v15 = vld [vmem:[#allocation5 + $0x230] ss:$8 sps:$4 sm:$0xff]   ;;  %v1464_v16 = vld [vmem:[#allocation5 + $0x44] ss:$8 sps:$4 sm:$0xff]  }
  0x3d   :  { %876 = vmatpush1.bf16.msra.mxu1 %v1450_v6  ;;  %v1466_v17 = vld [vmem:[#allocation5 + $0x244] ss:$8 sps:$4 sm:$0xff]   ;;  %v1468_v18 = vld [vmem:[#allocation5 + $0x40] ss:$8 sps:$4 sm:$0xff]   ;;  %v1470_v20 = vld [vmem:[#allocation5 + $0x54] ss:$8 sps:$4 sm:$0xff]  }
  0x3e   :  { %958 = vmatpush1.bf16.msra.mxu0 %v1451_v7  ;;  %877 = vmatprep.subr.bf16.mxu1 %v1452_v8  ;;  %v1469_v19 = vld [vmem:[#allocation5 + $0x240] ss:$8 sps:$4 sm:$0xff]   ;;  %v1472_v21 = vld [vmem:[#allocation5 + $0x254] ss:$8 sps:$4 sm:$0xff]   ;;  %v1474_v22 = vld [vmem:[#allocation5 + $0x50] ss:$8 sps:$4 sm:$0xff]  }
  0x3f   :  { %959 = vmatprep.subr.bf16.mxu0 %v1454_v9  ;;  %v1475_v23 = vld [vmem:[#allocation5 + $0x250] ss:$8 sps:$4 sm:$0xff]   ;;  %v1476_v24 = vld [vmem:[#allocation5 + $0x64] ss:$8 sps:$4 sm:$0xff]   ;;  %v1480_v26 = vld [vmem:[#allocation5 + $0x60] ss:$8 sps:$4 sm:$0xff]  }
  0x40   :  { %v1478_v25 = vld [vmem:[#allocation5 + $0x264] ss:$8 sps:$4 sm:$0xff]   ;;  %v1481_v27 = vld [vmem:[#allocation5 + $0x260] ss:$8 sps:$4 sm:$0xff]   ;;  %v1482_v28 = vld [vmem:[#allocation5 + $0x74] ss:$8 sps:$4 sm:$0xff]  }
  0x41   :  { %878 = vmatpush1.bf16.msra.mxu1 %v1456_v10  ;;  %v1484_v29 = vld [vmem:[#allocation5 + $0x274] ss:$8 sps:$4 sm:$0xff]   ;;  %v1486_v30 = vld [vmem:[#allocation5 + $0x70] ss:$8 sps:$4 sm:$0xff]   ;;  %v1488_v32 = vld [vmem:[#allocation5 + $0x84] ss:$8 sps:$4 sm:$0xff]  }
  0x42   :  { %960 = vmatpush1.bf16.msra.mxu0 %v1457_v11  ;;  %879 = vmatprep.subr.bf16.mxu1 %v1458_v12  ;;  %v1487_v31 = vld [vmem:[#allocation5 + $0x270] ss:$8 sps:$4 sm:$0xff]   ;;  %v1490_v33 = vld [vmem:[#allocation5 + $0x284] ss:$8 sps:$4 sm:$0xff]   ;;  %v1492_v34 = vld [vmem:[#allocation5 + $0x80] ss:$8 sps:$4 sm:$0xff]  }
  0x43   :  { %961 = vmatprep.subr.bf16.mxu0 %v1460_v13  ;;  %v1493_v35 = vld [vmem:[#allocation5 + $0x280] ss:$8 sps:$4 sm:$0xff]   ;;  %v1494_v36 = vld [vmem:[#allocation5 + $0x94] ss:$8 sps:$4 sm:$0xff]   ;;  %v1498_v38 = vld [vmem:[#allocation5 + $0x90] ss:$8 sps:$4 sm:$0xff]  }
  0x44   :  { %v1496_v37 = vld [vmem:[#allocation5 + $0x294] ss:$8 sps:$4 sm:$0xff]   ;;  %v1499_v39 = vld [vmem:[#allocation5 + $0x290] ss:$8 sps:$4 sm:$0xff]   ;;  %v1500_v40 = vld [vmem:[#allocation5 + $0xa4] ss:$8 sps:$4 sm:$0xff]  }
  0x45   :  { %880 = vmatpush1.bf16.msra.mxu1 %v1462_v14  ;;  %v1502_v41 = vld [vmem:[#allocation5 + $0x2a4] ss:$8 sps:$4 sm:$0xff]   ;;  %v1504_v42 = vld [vmem:[#allocation5 + $0xa0] ss:$8 sps:$4 sm:$0xff]   ;;  %v1506_v44 = vld [vmem:[#allocation5 + $0xb4] ss:$8 sps:$4 sm:$0xff]  }
  0x46   :  { %962 = vmatpush1.bf16.msra.mxu0 %v1463_v15  ;;  %881 = vmatprep.subr.bf16.mxu1 %v1464_v16  ;;  %v1505_v43 = vld [vmem:[#allocation5 + $0x2a0] ss:$8 sps:$4 sm:$0xff]   ;;  %v1508_v45 = vld [vmem:[#allocation5 + $0x2b4] ss:$8 sps:$4 sm:$0xff]   ;;  %v1510_v47 = vld [vmem:[#allocation5 + $0xb0] ss:$8 sps:$4 sm:$0xff]  }
  0x47   :  { %963 = vmatprep.subr.bf16.mxu0 %v1466_v17  ;;  %v61_v46 = vld [vmem:[#allocation2] sm:$0xff]  ;;  %v1511_v49 = vld [vmem:[#allocation5 + $0x2b0] ss:$8 sps:$4 sm:$0xff]   ;;  %v1518_v56 = vld [vmem:[#allocation5 + $0xd4] ss:$8 sps:$4 sm:$0xff]   ;;  %s1765_s8 = smov [#allocation8]  }
  0x48   :  { %v1244_v48 = vcombine.high %v61_v46, %v61_v46  ;;  %v63_v50 = vld [vmem:[#allocation2 + $0x10] sm:$0xff]  ;;  %v1512_v51 = vld [vmem:[#allocation5 + $0xc4] ss:$8 sps:$4 sm:$0xff]   ;;  %v1516_v54 = vld [vmem:[#allocation5 + $0xc0] ss:$8 sps:$4 sm:$0xff]   ;;  %v1243_v6 = vcombine.low %v61_v46, %v61_v46  ;;  %s1233_s9 = sshll.u32 %s1765_s8, 4  ;;  %s1234_s9 = int_to_ptr.vmem [resolvable:$true] %s1233_s9 }
  0x49   :  { %882 = vmatpush1.bf16.msra.mxu1 %v1468_v18  ;;  %v1514_v52 = vld [vmem:[#allocation5 + $0x2c4] ss:$8 sps:$4 sm:$0xff]   ;;  %v1248_v53 = vcombine.high %v63_v50, %v63_v50  ;;  %v1517_v55 = vld [vmem:[#allocation5 + $0x2c0] ss:$8 sps:$4 sm:$0xff]   ;;  %v1520_v57 = vld [vmem:[#allocation5 + $0x2d4] ss:$8 sps:$4 sm:$0xff]   ;;  %v1247_v7 = vcombine.low %v63_v50, %v63_v50  ;;  %p1735_p11 = scmp.lt.s32.totalorder %s1234_s9, %s1234_s9 }
  0x4a   :  { %964 = vmatpush1.bf16.msra.mxu0 %v1469_v19  ;;  %883 = vmatprep.subr.bf16.mxu1 %v1470_v20  ;;  %v1522_v58 = vld [vmem:[#allocation5 + $0xd0] ss:$8 sps:$4 sm:$0xff]   ;;  %v1524_v60 = vld [vmem:[#allocation5 + $0xe4] ss:$8 sps:$4 sm:$0xff]   ;;  %v1528_v62 = vld [vmem:[#allocation5 + $0xe0] ss:$8 sps:$4 sm:$0xff]  }
  0x4b   :  { %965 = vmatprep.subr.bf16.mxu0 %v1472_v21  ;;  %905 = vmatprep.mubr.bf16.mxu1 %v1244_v48  ;;  %v1523_v59 = vld [vmem:[#allocation5 + $0x2d0] ss:$8 sps:$4 sm:$0xff]   ;;  %v1526_v61 = vld [vmem:[#allocation5 + $0x2e4] ss:$8 sps:$4 sm:$0xff]   ;;  %v1529_v63 = vld [vmem:[#allocation5 + $0x2e0] ss:$8 sps:$4 sm:$0xff]  }
  0x4c   :  { %987 = vmatprep.mubr.bf16.mxu0 %v1248_v53  ;;  %v1530_v0 = vld [vmem:[#allocation5 + $0xf4] ss:$8 sps:$4 sm:$0xff]   ;;  %v1534_v2 = vld [vmem:[#allocation5 + $0xf0] ss:$8 sps:$4 sm:$0xff]   ;;  %v1540_v4 = vld [vmem:[#allocation5 + $0x104] ss:$8 sps:$4 sm:$0xff]  }
  0x4d   :  { %884 = vmatpush1.bf16.msra.mxu1 %v1474_v22  ;;  %v1532_v1 = vld [vmem:[#allocation5 + $0x2f4] ss:$8 sps:$4 sm:$0xff]   ;;  %v1535_v3 = vld [vmem:[#allocation5 + $0x2f0] ss:$8 sps:$4 sm:$0xff]   ;;  %v1545_v5 = vld [vmem:[#allocation5 + $0x304] ss:$8 sps:$4 sm:$0xff]  }
  0x4e   :  { %966 = vmatpush1.bf16.msra.mxu0 %v1475_v23  ;;  %885 = vmatprep.subr.bf16.mxu1 %v1476_v24  ;;  %v1538_v8 = vld [vmem:[#allocation5 + $0x100] ss:$8 sps:$4 sm:$0xff]   ;;  %v1548_v10 = vld [vmem:[#allocation5 + $0x114] ss:$8 sps:$4 sm:$0xff]   ;;  %v1546_v12 = vld [vmem:[#allocation5 + $0x110] ss:$8 sps:$4 sm:$0xff]  }
  0x4f   :  { %967 = vmatprep.subr.bf16.mxu0 %v1478_v25  ;;  %v1543_v9 = vld [vmem:[#allocation5 + $0x300] ss:$8 sps:$4 sm:$0xff]   ;;  %v1551_v11 = vld [vmem:[#allocation5 + $0x314] ss:$8 sps:$4 sm:$0xff]   ;;  %v1549_v13 = vld [vmem:[#allocation5 + $0x310] ss:$8 sps:$4 sm:$0xff]  }
  0x50   :  { %v1554_v14 = vld [vmem:[#allocation5 + $0x124] ss:$8 sps:$4 sm:$0xff]   ;;  %v1552_v16 = vld [vmem:[#allocation5 + $0x120] ss:$8 sps:$4 sm:$0xff]   ;;  %v1560_v18 = vld [vmem:[#allocation5 + $0x134] ss:$8 sps:$4 sm:$0xff]  }
  0x51   :  { %886 = vmatpush1.bf16.msra.mxu1 %v1480_v26  ;;  %v1557_v15 = vld [vmem:[#allocation5 + $0x324] ss:$8 sps:$4 sm:$0xff]   ;;  %v1555_v17 = vld [vmem:[#allocation5 + $0x320] ss:$8 sps:$4 sm:$0xff]   ;;  %v1563_v19 = vld [vmem:[#allocation5 + $0x334] ss:$8 sps:$4 sm:$0xff]  }
  0x52   :  { %968 = vmatpush1.bf16.msra.mxu0 %v1481_v27  ;;  %887 = vmatprep.subr.bf16.mxu1 %v1482_v28  ;;  %v1558_v20 = vld [vmem:[#allocation5 + $0x130] ss:$8 sps:$4 sm:$0xff]   ;;  %v1566_v22 = vld [vmem:[#allocation5 + $0x144] ss:$8 sps:$4 sm:$0xff]   ;;  %v1564_v24 = vld [vmem:[#allocation5 + $0x140] ss:$8 sps:$4 sm:$0xff]  }
  0x53   :  { %969 = vmatprep.subr.bf16.mxu0 %v1484_v29  ;;  %v1561_v21 = vld [vmem:[#allocation5 + $0x330] ss:$8 sps:$4 sm:$0xff]   ;;  %v1569_v23 = vld [vmem:[#allocation5 + $0x344] ss:$8 sps:$4 sm:$0xff]   ;;  %v1567_v25 = vld [vmem:[#allocation5 + $0x340] ss:$8 sps:$4 sm:$0xff]  }
  0x54   :  { %v1572_v26 = vld [vmem:[#allocation5 + $0x154] ss:$8 sps:$4 sm:$0xff]   ;;  %v1570_v28 = vld [vmem:[#allocation5 + $0x150] ss:$8 sps:$4 sm:$0xff]   ;;  %v1602_v50 = vld [vmem:[#allocation5 + $0x1a4] ss:$8 sps:$4 sm:$0xff]  }
  0x55   :  { %888 = vmatpush1.bf16.msra.mxu1 %v1486_v30  ;;  %v1575_v27 = vld [vmem:[#allocation5 + $0x354] ss:$8 sps:$4 sm:$0xff]   ;;  %v1573_v29 = vld [vmem:[#allocation5 + $0x350] ss:$8 sps:$4 sm:$0xff]   ;;  %v1578_v30 = vld [vmem:[#allocation5 + $0x164] ss:$8 sps:$4 sm:$0xff]  }
  0x56   :  { %970 = vmatpush1.bf16.msra.mxu0 %v1487_v31  ;;  %889 = vmatprep.subr.bf16.mxu1 %v1488_v32  ;;  %v1581_v31 = vld [vmem:[#allocation5 + $0x364] ss:$8 sps:$4 sm:$0xff]   ;;  %v1576_v32 = vld [vmem:[#allocation5 + $0x160] ss:$8 sps:$4 sm:$0xff]   ;;  %v1596_v46 = vld [vmem:[#allocation5 + $0x194] ss:$8 sps:$4 sm:$0xff]  }
  0x57   :  { %971 = vmatprep.subr.bf16.mxu0 %v1490_v33  ;;  %v1579_v33 = vld [vmem:[#allocation5 + $0x360] ss:$8 sps:$4 sm:$0xff]   ;;  %v1594_v48 = vld [vmem:[#allocation5 + $0x190] ss:$8 sps:$4 sm:$0xff]   ;;  %s1730_s10 = scalar_lea.vmem %s1234_s9, 128 }
  0x58   :  { %v1603_v53 = vld [vmem:[#allocation5 + $0x3a0] ss:$8 sps:$4 sm:$0xff]   ;;  %p1731_p10 = scmp.ne.s32.totalorder %s1234_s9, %s1730_s10  ;;  %p1736_p12 = scmp.lt.s32.totalorder %s1730_s10, %s1730_s10 }
  0x59   :  { %890 = vmatpush1.bf16.msra.mxu1 %v1492_v34  ;;  %v1832_v34 = vld [vmem:[#allocation2 + $0x8] sm:$0xff] }
  0x5a   :  { %972 = vmatpush1.bf16.msra.mxu0 %v1493_v35  ;;  %891 = vmatprep.subr.bf16.mxu1 %v1494_v36  ;;  %v1834_v35 = vld [vmem:[#allocation2 + $0x18] sm:$0xff]  ;;  %p1737_p13 = por %p1736_p12, %p1735_p11 }
  0x5b   :  { %973 = vmatprep.subr.bf16.mxu0 %v1496_v37  ;;  %v1584_v36 = vld [vmem:[#allocation5 + $0x174] ss:$8 sps:$4 sm:$0xff]  }
  0x5c   :  { %v1587_v37 = vld [vmem:[#allocation5 + $0x374] ss:$8 sps:$4 sm:$0xff]   ;;  %p1738_p0 = pnand %p1737_p13, %p1731_p10 }
  0x5d   :  { %892 = vmatpush1.bf16.msra.mxu1 %v1498_v38  ;;  %v1246_v38 = vcombine.high %v1832_v34, %v1832_v34 }
  0x5e   :  { %974 = vmatpush1.bf16.msra.mxu0 %v1499_v39  ;;  %893 = vmatprep.subr.bf16.mxu1 %v1500_v40  ;;  %v1250_v39 = vcombine.high %v1834_v35, %v1834_v35  ;;  %v1582_v40 = vld [vmem:[#allocation5 + $0x170] ss:$8 sps:$4 sm:$0xff]  }
  0x5f   :  { %975 = vmatprep.subr.bf16.mxu0 %v1502_v41  ;;  %v1585_v41 = vld [vmem:[#allocation5 + $0x370] ss:$8 sps:$4 sm:$0xff]  }
  0x61   :  { %894 = vmatpush1.bf16.msra.mxu1 %v1504_v42  ;;  %v1590_v42 = vld [vmem:[#allocation5 + $0x184] ss:$8 sps:$4 sm:$0xff]  }
  0x62   :  { %976 = vmatpush1.bf16.msra.mxu0 %v1505_v43  ;;  %895 = vmatprep.subr.bf16.mxu1 %v1506_v44  ;;  %v1593_v43 = vld [vmem:[#allocation5 + $0x384] ss:$8 sps:$4 sm:$0xff]   ;;  %v1588_v44 = vld [vmem:[#allocation5 + $0x180] ss:$8 sps:$4 sm:$0xff]  }
  0x63   :  { %977 = vmatprep.subr.bf16.mxu0 %v1508_v45  ;;  %v1591_v45 = vld [vmem:[#allocation5 + $0x380] ss:$8 sps:$4 sm:$0xff]  }
  0x65   :  { %896 = vmatpush1.bf16.msra.mxu1 %v1510_v47  ;;  %v1599_v47 = vld [vmem:[#allocation5 + $0x394] ss:$8 sps:$4 sm:$0xff]  }
  0x66   :  { %978 = vmatpush1.bf16.msra.mxu0 %v1511_v49  ;;  %897 = vmatprep.subr.bf16.mxu1 %v1512_v51  ;;  %v1597_v49 = vld [vmem:[#allocation5 + $0x390] ss:$8 sps:$4 sm:$0xff]   ;;  %v1605_v51 = vld [vmem:[#allocation5 + $0x3a4] ss:$8 sps:$4 sm:$0xff]  }
  0x67   :  { %979 = vmatprep.subr.bf16.mxu0 %v1514_v52  ;;  %v1600_v52 = vld [vmem:[#allocation5 + $0x1a0] ss:$8 sps:$4 sm:$0xff]  }
  0x69   :  { %898 = vmatpush1.bf16.msra.mxu1 %v1516_v54  ;;  %v1608_v54 = vld [vmem:[#allocation5 + $0x1b4] ss:$8 sps:$4 sm:$0xff]  }
  0x6a   :  { %980 = vmatpush1.bf16.msra.mxu0 %v1517_v55  ;;  %899 = vmatprep.subr.bf16.mxu1 %v1518_v56  ;;  %v1611_v55 = vld [vmem:[#allocation5 + $0x3b4] ss:$8 sps:$4 sm:$0xff]   ;;  %v1606_v56 = vld [vmem:[#allocation5 + $0x1b0] ss:$8 sps:$4 sm:$0xff]  }
  0x6b   :  { %981 = vmatprep.subr.bf16.mxu0 %v1520_v57  ;;  %v1609_v57 = vld [vmem:[#allocation5 + $0x3b0] ss:$8 sps:$4 sm:$0xff]  }
  0x6d   :  { %900 = vmatpush1.bf16.msra.mxu1 %v1522_v58  ;;  %v1614_v58 = vld [vmem:[#allocation5 + $0x1c4] ss:$8 sps:$4 sm:$0xff]  }
  0x6e   :  { %982 = vmatpush1.bf16.msra.mxu0 %v1523_v59  ;;  %901 = vmatprep.subr.bf16.mxu1 %v1524_v60  ;;  %v1617_v59 = vld [vmem:[#allocation5 + $0x3c4] ss:$8 sps:$4 sm:$0xff]   ;;  %v1612_v60 = vld [vmem:[#allocation5 + $0x1c0] ss:$8 sps:$4 sm:$0xff]  }
  0x6f   :  { %983 = vmatprep.subr.bf16.mxu0 %v1526_v61  ;;  %v1615_v61 = vld [vmem:[#allocation5 + $0x3c0] ss:$8 sps:$4 sm:$0xff]  }
  0x71   :  { %902 = vmatpush1.bf16.msra.mxu1 %v1528_v62  ;;  %v1620_v62 = vld [vmem:[#allocation5 + $0x1d4] ss:$8 sps:$4 sm:$0xff]  }
  0x72   :  { %984 = vmatpush1.bf16.msra.mxu0 %v1529_v63  ;;  %903 = vmatprep.subr.bf16.mxu1 %v1530_v0  ;;  %v1623_v63 = vld [vmem:[#allocation5 + $0x3d4] ss:$8 sps:$4 sm:$0xff]   ;;  %v1618_v0 = vld [vmem:[#allocation5 + $0x1d0] ss:$8 sps:$4 sm:$0xff]  }
  0x73   :  { %985 = vmatprep.subr.bf16.mxu0 %v1532_v1  ;;  %v1621_v1 = vld [vmem:[#allocation5 + $0x3d0] ss:$8 sps:$4 sm:$0xff]  }
  0x75   :  { %904 = vmatpush1.bf16.msra.mxu1 %v1534_v2  ;;  %v1626_v2 = vld [vmem:[#allocation5 + $0x1e4] ss:$8 sps:$4 sm:$0xff]  }
  0x76   :  { %986 = vmatpush1.bf16.msra.mxu0 %v1535_v3  ;;  %914 = vmatprep.subr.bf16.mxu1 %v1540_v4  ;;  %v1629_v3 = vld [vmem:[#allocation5 + $0x3e4] ss:$8 sps:$4 sm:$0xff]   ;;  %v1624_v4 = vld [vmem:[#allocation5 + $0x1e0] ss:$8 sps:$4 sm:$0xff]  }
  0x77   :  { %996 = vmatprep.subr.bf16.mxu0 %v1545_v5  ;;  %v1627_v5 = vld [vmem:[#allocation5 + $0x3e0] ss:$8 sps:$4 sm:$0xff]  }
  0x78   :  { %906 = vmatmul.mubr.bf16.vlgmr.msra.gmra.mrb[0].mxu1 %v1243_v6  ;;  %v1632_v6 = vld [vmem:[#allocation5 + $0x1f4] ss:$8 sps:$4 sm:$0xff]  }
  0x79   :  { %988 = vmatmul.mubr.bf16.vlgmr.msra.gmra.mrb[0].mxu0 %v1247_v7  ;;  %915 = vmatpush1.bf16.msra.mxu1 %v1538_v8  ;;  %v1635_v7 = vld [vmem:[#allocation5 + $0x3f4] ss:$8 sps:$4 sm:$0xff]   ;;  %v1630_v8 = vld [vmem:[#allocation5 + $0x1f0] ss:$8 sps:$4 sm:$0xff]  }
  0x7a   :  { %997 = vmatpush1.bf16.msra.mxu0 %v1543_v9  ;;  %916 = vmatprep.subr.bf16.mxu1 %v1548_v10  ;;  %v1633_v9 = vld [vmem:[#allocation5 + $0x3f0] ss:$8 sps:$4 sm:$0xff]   ;;  %v1245_v10 = vcombine.low %v1832_v34, %v1832_v34 }
  0x7b   :  { %998 = vmatprep.subr.bf16.mxu0 %v1551_v11  ;;  %946 = vmatprep.mubr.bf16.mxu1 %v1246_v38  ;;  %v1249_v11 = vcombine.low %v1834_v35, %v1834_v35 }
  0x7c   :  { %1028 = vmatprep.mubr.bf16.mxu0 %v1250_v39 }
  0x7d   :  { %917 = vmatpush1.bf16.msra.mxu1 %v1546_v12  ;;  %v1640_v12 = vld [vmem:[#allocation7 + $0x40] sm:$0xff]  }
  0x7e   :  { %999 = vmatpush1.bf16.msra.mxu0 %v1549_v13  ;;  %918 = vmatprep.subr.bf16.mxu1 %v1554_v14  ;;  %v1641_v13 = vld [vmem:[#allocation7] sm:$0xff]   ;;  %v1642_v14 = vld [vmem:[#allocation7 + $0x48] sm:$0xff]  }
  0x7f   :  { %1000 = vmatprep.subr.bf16.mxu0 %v1557_v15  ;;  %v1643_v15 = vld [vmem:[#allocation7 + $0x8] sm:$0xff]  }
  0x81   :  { %919 = vmatpush1.bf16.msra.mxu1 %v1552_v16  ;;  %v1644_v16 = vld [vmem:[#allocation7 + $0x50] sm:$0xff]  }
  0x82   :  { %1001 = vmatpush1.bf16.msra.mxu0 %v1555_v17  ;;  %920 = vmatprep.subr.bf16.mxu1 %v1560_v18  ;;  %v1645_v17 = vld [vmem:[#allocation7 + $0x10] sm:$0xff]   ;;  %v1646_v18 = vld [vmem:[#allocation7 + $0x58] sm:$0xff]  }
  0x83   :  { %1002 = vmatprep.subr.bf16.mxu0 %v1563_v19  ;;  %v1647_v19 = vld [vmem:[#allocation7 + $0x18] sm:$0xff]  }
  0x85   :  { %921 = vmatpush1.bf16.msra.mxu1 %v1558_v20  ;;  %v1648_v20 = vld [vmem:[#allocation7 + $0x60] sm:$0xff]  }
  0x86   :  { %1003 = vmatpush1.bf16.msra.mxu0 %v1561_v21  ;;  %922 = vmatprep.subr.bf16.mxu1 %v1566_v22  ;;  %v1649_v21 = vld [vmem:[#allocation7 + $0x20] sm:$0xff]   ;;  %v1650_v22 = vld [vmem:[#allocation7 + $0x68] sm:$0xff]  }
  0x87   :  { %1004 = vmatprep.subr.bf16.mxu0 %v1569_v23  ;;  %v1651_v23 = vld [vmem:[#allocation7 + $0x28] sm:$0xff]  }
  0x89   :  { %923 = vmatpush1.bf16.msra.mxu1 %v1564_v24  ;;  %v1652_v24 = vld [vmem:[#allocation7 + $0x70] sm:$0xff]  }
  0x8a   :  { %1005 = vmatpush1.bf16.msra.mxu0 %v1567_v25  ;;  %924 = vmatprep.subr.bf16.mxu1 %v1572_v26  ;;  %v1653_v25 = vld [vmem:[#allocation7 + $0x30] sm:$0xff]   ;;  %v1654_v26 = vld [vmem:[#allocation7 + $0x78] sm:$0xff]  }
  0x8b   :  { %1006 = vmatprep.subr.bf16.mxu0 %v1575_v27  ;;  %v1655_v27 = vld [vmem:[#allocation7 + $0x38] sm:$0xff]  }
  0x8d   :  { %925 = vmatpush1.bf16.msra.mxu1 %v1570_v28  ;;  %v195_v28 = vlaneseq }
  0x8e   :  { %1007 = vmatpush1.bf16.msra.mxu0 %v1573_v29  ;;  %926 = vmatprep.subr.bf16.mxu1 %v1578_v30 }
  0x8f   :  { %1008 = vmatprep.subr.bf16.mxu0 %v1581_v31  ;;  %v196_v29 = vshrl.u32 %v195_v28, 7  ;;  %v193_v31 = vld [vmem:[%s1864_s2] sm:$0x3] }
  0x91   :  { %927 = vmatpush1.bf16.msra.mxu1 %v1576_v32  ;;  %v197_v30 = vsub.s32 0, %v196_v29  ;;  %v201_v32 = vsub.s32 1, %v196_v29 }
  0x92   :  { %1009 = vmatpush1.bf16.msra.mxu0 %v1579_v33  ;;  %928 = vmatprep.subr.bf16.mxu1 %v1584_v36 }
  0x93   :  { %1010 = vmatprep.subr.bf16.mxu0 %v1587_v37  ;;  %v198_v33 = vrot.slane %v193_v31, %v197_v30  ;;  %v202_v34 = vrot.slane %v193_v31, %v201_v32 }
  0x95   :  { %929 = vmatpush1.bf16.msra.mxu1 %v1582_v40 }
  0x96   :  { %1011 = vmatpush1.bf16.msra.mxu0 %v1585_v41  ;;  %930 = vmatprep.subr.bf16.mxu1 %v1590_v42 }
  0x97   :  { %1012 = vmatprep.subr.bf16.mxu0 %v1593_v43 }
  0x99   :  { %931 = vmatpush1.bf16.msra.mxu1 %v1588_v44 }
  0x9a   :  { %1013 = vmatpush1.bf16.msra.mxu0 %v1591_v45  ;;  %932 = vmatprep.subr.bf16.mxu1 %v1596_v46 }
  0x9b   :  { %1014 = vmatprep.subr.bf16.mxu0 %v1599_v47 }
  0x9d   :  { %933 = vmatpush1.bf16.msra.mxu1 %v1594_v48 }
  0x9e   :  { %1015 = vmatpush1.bf16.msra.mxu0 %v1597_v49  ;;  %934 = vmatprep.subr.bf16.mxu1 %v1602_v50 }
  0x9f   :  { %1016 = vmatprep.subr.bf16.mxu0 %v1605_v51 }
  0xa1   :  { %935 = vmatpush1.bf16.msra.mxu1 %v1600_v52 }
  0xa2   :  { %1017 = vmatpush1.bf16.msra.mxu0 %v1603_v53  ;;  %936 = vmatprep.subr.bf16.mxu1 %v1608_v54 }
  0xa3   :  { %1018 = vmatprep.subr.bf16.mxu0 %v1611_v55 }
  0xa5   :  { %937 = vmatpush1.bf16.msra.mxu1 %v1606_v56 }
  0xa6   :  { %1019 = vmatpush1.bf16.msra.mxu0 %v1609_v57  ;;  %938 = vmatprep.subr.bf16.mxu1 %v1614_v58  ;;  %v1381_v58 = vld [vmem:[%s1866_s4] ss:$0 sm:$0xff] }
  0xa7   :  { %1020 = vmatprep.subr.bf16.mxu0 %v1617_v59 }
  0xa9   :  { %939 = vmatpush1.bf16.msra.mxu1 %v1612_v60 }
  0xaa   :  { %1021 = vmatpush1.bf16.msra.mxu0 %v1615_v61  ;;  %940 = vmatprep.subr.bf16.mxu1 %v1620_v62 }
  0xab   :  { %1022 = vmatprep.subr.bf16.mxu0 %v1623_v63 }
  0xad   :  { %941 = vmatpush1.bf16.msra.mxu1 %v1618_v0 }
  0xae   :  { %1023 = vmatpush1.bf16.msra.mxu0 %v1621_v1  ;;  %942 = vmatprep.subr.bf16.mxu1 %v1626_v2 }
  0xaf   :  { %1024 = vmatprep.subr.bf16.mxu0 %v1629_v3 }
  0xb1   :  { %943 = vmatpush1.bf16.msra.mxu1 %v1624_v4 }
  0xb2   :  { %1025 = vmatpush1.bf16.msra.mxu0 %v1627_v5  ;;  %944 = vmatprep.subr.bf16.mxu1 %v1632_v6 }
  0xb3   :  { %1026 = vmatprep.subr.bf16.mxu0 %v1635_v7 }
  0xb5   :  { %945 = vmatpush1.bf16.msra.mxu1 %v1630_v8 }
  0xb6   :  { %1027 = vmatpush1.bf16.msra.mxu0 %v1633_v9  ;;  %1398 = vmatprep.subr.bf16.mxu1 %v1640_v12 }
  0xb8   :  { %947 = vmatmul.mubr.bf16.vlgmr.msra.gmra.mrb[0].mxu1 %v1245_v10 }
  0xb9   :  { %1029 = vmatmul.mubr.bf16.vlgmr.msra.gmra.mrb[0].mxu0 %v1249_v11  ;;  %1399 = vmatpush3.bf16.msra.mxu1 %v1641_v13 }
  0xba   :  { %1400 = vmatprep.subr.bf16.mxu1 %v1642_v14 }
  0xbd   :  { %1401 = vmatpush3.bf16.msra.mxu1 %v1643_v15 }
  0xbe   :  { %1402 = vmatprep.subr.bf16.mxu1 %v1644_v16 }
  0xc1   :  { %1403 = vmatpush3.bf16.msra.mxu1 %v1645_v17 }
  0xc2   :  { %1404 = vmatprep.subr.bf16.mxu1 %v1646_v18 }
  0xc5   :  { %1405 = vmatpush3.bf16.msra.mxu1 %v1647_v19 }
  0xc6   :  { %1406 = vmatprep.subr.bf16.mxu1 %v1648_v20 }
  0xc9   :  { %1407 = vmatpush3.bf16.msra.mxu1 %v1649_v21 }
  0xca   :  { %1408 = vmatprep.subr.bf16.mxu1 %v1650_v22 }
  0xcd   :  { %1409 = vmatpush3.bf16.msra.mxu1 %v1651_v23 }
  0xce   :  { %1410 = vmatprep.subr.bf16.mxu1 %v1652_v24 }
  0xd1   :  { %1411 = vmatpush3.bf16.msra.mxu1 %v1653_v25 }
  0xd2   :  { %1412 = vmatprep.subr.bf16.mxu1 %v1654_v26 }
  0xd5   :  { %1413 = vmatpush3.bf16.msra.mxu1 %v1655_v27 }
 0x18b   :  { %v948_v35 = vpop.f32.mrb[0].mxu1 }
 0x18c   :  { %v1030_v36 = vpop.f32.mrb[0].mxu0  ;;  %v1420_v37 = vadd.f32 %v948_v35, %v198_v33  ;;  %v950_v38 = vpop.f32.mrb[1].mxu1 }
 0x18d   :  { %v1032_v39 = vpop.f32.mrb[1].mxu0  ;;  %v1422_v40 = vadd.f32 %v950_v38, %v202_v34  ;;  %v952_v41 = vpop.f32.mrb[2].mxu1 }
 0x18e   :  { %v1034_v42 = vpop.f32.mrb[2].mxu0  ;;  %v1421_v43 = vadd.f32 %v1420_v37, %v1030_v36  ;;  %v953_v44 = vpop.f32.mrb[3].mxu1 }
 0x18f   :  { %v1035_v45 = vpop.f32.mrb[3].mxu0  ;;  %v1423_v46 = vadd.f32 %v1422_v40, %v1032_v39 }
 0x190   :  { %v1379_v47 = vmul.f32 -1.442695, %v1421_v43 }
 0x191   :  { %v1380_v48 = vmul.f32 -1.442695, %v1423_v46 }
 0x192   :  { %1656 = vpow2.f32 %v1379_v47 }
 0x193   :  { %1658 = vpow2.f32 %v1380_v48 }
 0x19c   :  { %v1657_v49 = vpop.eup %1656 }
 0x19d   :  { %v1659_v50 = vpop.eup %1658  ;;  %v1043_v51 = vadd.f32 1.0, %v1657_v49 }
 0x19e   :  { %v1044_v52 = vadd.f32 1.0, %v1659_v50 }
 0x19f   :  { %1660 = vrcp.f32 %v1043_v51 }
 0x1a0   :  { %1662 = vrcp.f32 %v1044_v52 }
 0x1a9   :  { %v1661_v53 = vpop.eup %1660 }
 0x1aa   :  { %v1663_v54 = vpop.eup %1662  ;;  %v1049_v56 = vpack.c.bf16 %v1661_v53, %v1661_v53 }
 0x1ab   :  { %v1050_v55 = vpack.c.bf16 %v1663_v54, %v1663_v54 }
 0x1ad   :  { %1218 = vmatprep.mubr.bf16.mxu1 %v1050_v55 }
 0x1ae   :  { %1219 = vmatmul.mubr.bf16.vlgmr.msra.gmra.mrb[4].mxu1 %v1049_v56 }
 0x281   :  { %v1414_v57 = vpop.f32.mrb[4].mxu1 }
 0x282   :  { %v1415_v59 = vpop.f32.mrb[5].mxu1 }
 0x283   :  { %v1416_v60 = vadd.f32 %v1415_v59, %v1414_v57  ;;  %v1417_v61 = vpop.f32.mrb[6].mxu1 }
 0x284   :  { %v1418_v62 = vpop.f32.mrb[7].mxu1 }
 0x285   :  { %v1221_v63 = vadd.f32 %v1416_v60, %v1381_v58 }
 0x287   :  { %1226 = vst [vmem:[#allocation8] sm:$0xff] %v1221_v63 }
 0x288   :  { %1741 = shalt.err (!%p1738_p0)
}
 0x289   :  { %s1742_s4 = scalar_lea.hbm %s1867_s5, 128 }
 0x28a   :  { %p1743_p1 = scmp.ne.s32.totalorder %s1867_s5, %s1742_s4  ;;  %p1746_p2 = scmp.lt.u32.totalorder %s1742_s4, %s1867_s5 }
 0x28c   :  { %p1748_p3 = pnand %p1746_p2, %p1743_p1 }
 0x28e   :  { %1751 = shalt.err (!%p1748_p3)
}
 0x28f   :  { %1236 = dma.vmem_to_hbm [thread:$0]  %s1234_s9, 128, %s1867_s5, [#allocation4]  }
 0x290   :  { %1756 = dma.done.wait [#allocation4], 128  }
 0x291   :  { %1757 = vsyncadd [#allocation4], 4294967168 }
 0x292   :  { %1240 = vsyncpa [#allocation3], 1 }
 0x293   :  { %1241 = vsyncpa [#allocation6], 1 }
 0x294   :  { %1242 = vsyncpa [#allocation4], 1 }

</bundles_post_ra>
